<compile_context>
chip_gen: v7x
topology: tpu7x:2x2x1
jax: 0.10.0
libtpu: 0.0.40
codegen_flags: <defaults>
</compile_context>

<pallas_src>
import jax
import jax.numpy as jnp
from jax.experimental import pallas as pl
from jax.experimental.pallas import tpu as pltpu

D_IN = 1024     # input features
D_HID = 128     # hidden features
D_OUT = 14      # real logits (10 discrete + 2 mu + 2 log-var)
D_PAD = 128     # logits / output padded to a full lane width
BN_EPS = 1e-5
LEAKY_SLOPE = 0.2
NEG_FILL = -3e38  # finite "-inf" fill for masked softmax lanes


def _recognition_kernel(y_ref, w1_ref, b1_ref, gamma_ref, beta_ref,
                        w2_ref, b2_ref, out_ref):
    # ---- Linear(1024 -> 128): bf16 inputs, f32 accumulate on the MXU ----
    h = jnp.dot(y_ref[...], w1_ref[...], preferred_element_type=jnp.float32)
    h = h + b1_ref[...]                                   # (B, 128) f32

    # ---- BatchNorm1d(128), training-mode batch stats, folded scale/shift ----
    mean = jnp.mean(h, axis=0, keepdims=True)             # (1, 128)
    var = jnp.mean((h - mean) * (h - mean), axis=0, keepdims=True)  # biased
    scale = gamma_ref[...] * jax.lax.rsqrt(var + BN_EPS)  # (1, 128)
    shift = beta_ref[...] - mean * scale                  # (1, 128)
    h = h * scale + shift

    # ---- LeakyReLU(0.2) ----
    h = jnp.where(h > 0.0, h, LEAKY_SLOPE * h)

    # ---- Linear(128 -> 14), zero-padded to 128 lanes (lane-dense) ----
    logits = jnp.dot(h, w2_ref[...], preferred_element_type=jnp.float32)
    logits = logits + b2_ref[...]                         # (B, 128)

    col = jax.lax.broadcasted_iota(jnp.int32, logits.shape, 1)

    # Stable softmax over columns [0, 10) using a lane mask (no sub-vreg slices).
    disc = jnp.where(col < 10, logits, NEG_FILL)
    disc = disc - jnp.max(disc, axis=-1, keepdims=True)
    e = jnp.where(col < 10, jnp.exp(disc), 0.0)
    sm = e * pl.reciprocal(jnp.sum(e, axis=-1, keepdims=True), approx=True)

    # Merged heads, one lane-dense store:
    #   cols [0:10)  softmax, [10:12) mu, [12:) exp(logits) (only [12:14) used).
    out_ref[...] = jnp.where(col < 10, sm,
                             jnp.where(col < 12, logits, jnp.exp(logits)))


def recognition_network(y, params):
    w1, b1, gamma, beta, w2, b2 = params
    B = y.shape[0]
    assert B % 8 == 0, "batch must be a multiple of 8 (sublane alignment)"

    # bf16 for the big (B,1024)@(1024,128) matmul operands; f32 accumulation.
    y_bf = y.astype(jnp.bfloat16)
    w1_bf = w1.astype(jnp.bfloat16)

    # Zero-pad the second Linear to a full 128-lane output (padding cols stay 0).
    w2p = jnp.zeros((D_HID, D_PAD), jnp.float32).at[:, :D_OUT].set(w2)
    b2p = jnp.zeros((1, D_PAD), jnp.float32).at[:, :D_OUT].set(b2)

    vmem = pl.BlockSpec(memory_space=pltpu.MemorySpace.VMEM)
    out = pl.pallas_call(
        _recognition_kernel,
        out_shape=jax.ShapeDtypeStruct((B, D_PAD), jnp.float32),
        in_specs=[vmem] * 7,
        out_specs=vmem,
    )(y_bf, w1_bf, b1, gamma, beta, w2p, b2p)

    # Slice the merged lane-dense buffer apart in the wrapper.
    return out[:, 0:10], out[:, 10:12], out[:, 12:14]


def init_params(key):
    """Deterministic init mimicking PyTorch Linear defaults (U[-1/sqrt(fan_in), +])."""
    k1, k2, k3, k4 = jax.random.split(key, 4)
    lim1 = 1.0 / jnp.sqrt(jnp.float32(D_IN))
    lim2 = 1.0 / jnp.sqrt(jnp.float32(D_HID))
    w1 = jax.random.uniform(k1, (D_IN, D_HID), jnp.float32, -lim1, lim1)
    b1 = jax.random.uniform(k2, (1, D_HID), jnp.float32, -lim1, lim1)
    gamma = jnp.ones((1, D_HID), jnp.float32)   # BatchNorm1d weight
    beta = jnp.zeros((1, D_HID), jnp.float32)   # BatchNorm1d bias
    w2 = jax.random.uniform(k3, (D_HID, D_OUT), jnp.float32, -lim2, lim2)
    b2 = jax.random.uniform(k4, (1, D_OUT), jnp.float32, -lim2, lim2)
    return (w1, b1, gamma, beta, w2, b2)


def _reference(y, params):
    """Pure-JAX reference (same bf16 cast for the first matmul operands)."""
    w1, b1, gamma, beta, w2, b2 = params
    yb = y.astype(jnp.bfloat16).astype(jnp.float32)
    w1b = w1.astype(jnp.bfloat16).astype(jnp.float32)
    h = yb @ w1b + b1
    mean = jnp.mean(h, axis=0, keepdims=True)
    var = jnp.mean((h - mean) ** 2, axis=0, keepdims=True)
    h = (h - mean) / jnp.sqrt(var + BN_EPS) * gamma + beta
    h = jnp.where(h > 0, h, LEAKY_SLOPE * h)
    logits = h @ w2 + b2
    yd = jax.nn.softmax(logits[:, 0:10], axis=1)
    return yd, logits[:, 10:12], jnp.exp(logits[:, 12:14])


if __name__ == "__main__":
    B = 8
    key = jax.random.PRNGKey(0)
    k_y, k_p = jax.random.split(key)
    y = jax.random.normal(k_y, (B, D_IN), jnp.float32)
    params = init_params(k_p)

    y_discrete, y_mu, y_var = jax.block_until_ready(recognition_network(y, params))

    ref_d, ref_mu, ref_var = _reference(y, params)
    assert y_discrete.shape == (B, 10) and y_mu.shape == (B, 2) and y_var.shape == (B, 2)
    assert jnp.allclose(y_discrete, ref_d, rtol=2e-3, atol=2e-3)
    assert jnp.allclose(y_mu, ref_mu, rtol=2e-3, atol=2e-3)
    assert jnp.allclose(y_var, ref_var, rtol=2e-3, atol=2e-3)

    print("KERNEL_OK")
</pallas_src>

<mosaic_0001>
module attributes {stable_mosaic.version = 11 : i64} {
  func.func @_recognition_kernel(%arg0: memref<8x1024xbf16, #tpu.memory_space<vmem>>, %arg1: memref<1024x128xbf16, #tpu.memory_space<vmem>>, %arg2: memref<1x128xf32, #tpu.memory_space<vmem>>, %arg3: memref<1x128xf32, #tpu.memory_space<vmem>>, %arg4: memref<1x128xf32, #tpu.memory_space<vmem>>, %arg5: memref<128x128xf32, #tpu.memory_space<vmem>>, %arg6: memref<1x128xf32, #tpu.memory_space<vmem>>, %arg7: memref<8x128xf32, #tpu.memory_space<vmem>>) attributes {dimension_semantics = [], scalar_prefetch = 0 : i64, scratch_operands = 0 : i64, tpu.core_type = #tpu.core_type<tc>} {
    %c0 = arith.constant 0 : index
    %c0_0 = arith.constant 0 : index
    %0 = vector.load %arg0[%c0, %c0_0] : memref<8x1024xbf16, #tpu.memory_space<vmem>>, vector<8x1024xbf16>
    %c0_1 = arith.constant 0 : index
    %c0_2 = arith.constant 0 : index
    %1 = vector.load %arg1[%c0_1, %c0_2] : memref<1024x128xbf16, #tpu.memory_space<vmem>>, vector<1024x128xbf16>
    %cst = arith.constant dense<0.000000e+00> : vector<8x128xf32>
    %2 = tpu.matmul %0, %1, %cst {dimension_numbers = #tpu.dot_dimension_numbers<[1], [0], [0], [1], [0, 0, 1, 1], [], []>} : vector<8x1024xbf16>, vector<1024x128xbf16>, vector<8x128xf32> -> vector<8x128xf32>
    %c0_3 = arith.constant 0 : index
    %c0_4 = arith.constant 0 : index
    %3 = vector.load %arg2[%c0_3, %c0_4] : memref<1x128xf32, #tpu.memory_space<vmem>>, vector<1x128xf32>
    %4 = vector.broadcast %3 : vector<1x128xf32> to vector<8x128xf32>
    %5 = arith.addf %2, %4 : vector<8x128xf32>
    %cst_5 = arith.constant dense<0.000000e+00> : vector<128xf32>
    %6 = vector.multi_reduction <add>, %5, %cst_5 [0] : vector<8x128xf32> to vector<128xf32>
    %7 = vector.shape_cast %6 : vector<128xf32> to vector<1x128xf32>
    %cst_6 = arith.constant 8.000000e+00 : f32
    %8 = vector.broadcast %cst_6 : f32 to vector<1x128xf32>
    %9 = arith.divf %7, %8 : vector<1x128xf32>
    %10 = vector.broadcast %9 : vector<1x128xf32> to vector<8x128xf32>
    %11 = arith.subf %5, %10 : vector<8x128xf32>
    %12 = vector.broadcast %9 : vector<1x128xf32> to vector<8x128xf32>
    %13 = arith.subf %5, %12 : vector<8x128xf32>
    %14 = arith.mulf %11, %13 : vector<8x128xf32>
    %cst_7 = arith.constant dense<0.000000e+00> : vector<128xf32>
    %15 = vector.multi_reduction <add>, %14, %cst_7 [0] : vector<8x128xf32> to vector<128xf32>
    %16 = vector.shape_cast %15 : vector<128xf32> to vector<1x128xf32>
    %cst_8 = arith.constant 8.000000e+00 : f32
    %17 = vector.broadcast %cst_8 : f32 to vector<1x128xf32>
    %18 = arith.divf %16, %17 : vector<1x128xf32>
    %c0_9 = arith.constant 0 : index
    %c0_10 = arith.constant 0 : index
    %19 = vector.load %arg3[%c0_9, %c0_10] : memref<1x128xf32, #tpu.memory_space<vmem>>, vector<1x128xf32>
    %cst_11 = arith.constant 9.99999974E-6 : f32
    %20 = vector.broadcast %cst_11 : f32 to vector<1x128xf32>
    %21 = arith.addf %18, %20 : vector<1x128xf32>
    %22 = math.rsqrt %21 : vector<1x128xf32>
    %23 = arith.mulf %19, %22 : vector<1x128xf32>
    %c0_12 = arith.constant 0 : index
    %c0_13 = arith.constant 0 : index
    %24 = vector.load %arg4[%c0_12, %c0_13] : memref<1x128xf32, #tpu.memory_space<vmem>>, vector<1x128xf32>
    %25 = arith.mulf %9, %23 : vector<1x128xf32>
    %26 = arith.subf %24, %25 : vector<1x128xf32>
    %27 = vector.broadcast %23 : vector<1x128xf32> to vector<8x128xf32>
    %28 = arith.mulf %5, %27 : vector<8x128xf32>
    %29 = vector.broadcast %26 : vector<1x128xf32> to vector<8x128xf32>
    %30 = arith.addf %28, %29 : vector<8x128xf32>
    %cst_14 = arith.constant 0.000000e+00 : f32
    %31 = vector.broadcast %cst_14 : f32 to vector<8x128xf32>
    %32 = arith.cmpf ogt, %30, %31 : vector<8x128xf32>
    %cst_15 = arith.constant 2.000000e-01 : f32
    %33 = vector.broadcast %cst_15 : f32 to vector<8x128xf32>
    %34 = arith.mulf %33, %30 : vector<8x128xf32>
    %35 = arith.select %32, %30, %34 : vector<8x128xi1>, vector<8x128xf32>
    %c0_16 = arith.constant 0 : index
    %c0_17 = arith.constant 0 : index
    %36 = vector.load %arg5[%c0_16, %c0_17] : memref<128x128xf32, #tpu.memory_space<vmem>>, vector<128x128xf32>
    %cst_18 = arith.constant dense<0.000000e+00> : vector<8x128xf32>
    %37 = tpu.matmul %35, %36, %cst_18 {dimension_numbers = #tpu.dot_dimension_numbers<[1], [0], [0], [1], [0, 0, 1, 1], [], []>} : vector<8x128xf32>, vector<128x128xf32>, vector<8x128xf32> -> vector<8x128xf32>
    %c0_19 = arith.constant 0 : index
    %c0_20 = arith.constant 0 : index
    %38 = vector.load %arg6[%c0_19, %c0_20] : memref<1x128xf32, #tpu.memory_space<vmem>>, vector<1x128xf32>
    %39 = vector.broadcast %38 : vector<1x128xf32> to vector<8x128xf32>
    %40 = arith.addf %37, %39 : vector<8x128xf32>
    %41 = tpu.iota {dimensions = array<i32: 1>} : vector<8x128xi32>
    %c10_i32 = arith.constant 10 : i32
    %42 = vector.broadcast %c10_i32 : i32 to vector<8x128xi32>
    %43 = arith.cmpi slt, %41, %42 : vector<8x128xi32>
    %cst_21 = arith.constant -3.000000e+38 : f32
    %44 = vector.broadcast %cst_21 : f32 to vector<8x128xf32>
    %45 = arith.select %43, %40, %44 : vector<8x128xi1>, vector<8x128xf32>
    %cst_22 = arith.constant dense<0xFF800000> : vector<8xf32>
    %46 = vector.multi_reduction <maximumf>, %45, %cst_22 [1] : vector<8x128xf32> to vector<8xf32>
    %47 = vector.shape_cast %46 : vector<8xf32> to vector<8x1xf32>
    %48 = vector.broadcast %47 : vector<8x1xf32> to vector<8x128xf32>
    %49 = arith.subf %45, %48 : vector<8x128xf32>
    %c10_i32_23 = arith.constant 10 : i32
    %50 = vector.broadcast %c10_i32_23 : i32 to vector<8x128xi32>
    %51 = arith.cmpi slt, %41, %50 : vector<8x128xi32>
    %52 = math.exp %49 : vector<8x128xf32>
    %cst_24 = arith.constant 0.000000e+00 : f32
    %53 = vector.broadcast %cst_24 : f32 to vector<8x128xf32>
    %54 = arith.select %51, %52, %53 : vector<8x128xi1>, vector<8x128xf32>
    %cst_25 = arith.constant dense<0.000000e+00> : vector<8xf32>
    %55 = vector.multi_reduction <add>, %54, %cst_25 [1] : vector<8x128xf32> to vector<8xf32>
    %56 = vector.shape_cast %55 : vector<8xf32> to vector<8x1xf32>
    %57 = tpu.reciprocal %56 {approx = true} : vector<8x1xf32> -> vector<8x1xf32>
    %58 = vector.broadcast %57 : vector<8x1xf32> to vector<8x128xf32>
    %59 = arith.mulf %54, %58 : vector<8x128xf32>
    %c10_i32_26 = arith.constant 10 : i32
    %60 = vector.broadcast %c10_i32_26 : i32 to vector<8x128xi32>
    %61 = arith.cmpi slt, %41, %60 : vector<8x128xi32>
    %c12_i32 = arith.constant 12 : i32
    %62 = vector.broadcast %c12_i32 : i32 to vector<8x128xi32>
    %63 = arith.cmpi slt, %41, %62 : vector<8x128xi32>
    %64 = math.exp %40 : vector<8x128xf32>
    %65 = arith.select %63, %40, %64 : vector<8x128xi1>, vector<8x128xf32>
    %66 = arith.select %61, %59, %65 : vector<8x128xi1>, vector<8x128xf32>
    %c0_27 = arith.constant 0 : index
    %c0_28 = arith.constant 0 : index
    %67 = vector.load %arg7[%c0_27, %c0_28] : memref<8x128xf32, #tpu.memory_space<vmem>>, vector<8x128xf32>
    tpu.vector_store %arg7[%c0_27, %c0_28], %66 {strides = array<i32>} : memref<8x128xf32, #tpu.memory_space<vmem>>, vector<8x128xf32>,
    return
  }
}

</mosaic_0001>

<bundles_post_ra>
// kernel: tpu_custom_call.1
= control target key start
LH: loop header
LB: loop body
LE: loop exit
PB: predicated region body
PF: predicated region fallthrough
CT: control target
= control target key end

     0   :  { %12 = vsyncpa [#allocation3], 0  ;;  %s1485_s0 = inlined_call_operand.hbm [shape: bf16[8,1024], index: 0, kind: input, shape index: {}]   ;;  %s1486_s1 = inlined_call_operand.hbm [shape: bf16[1024,128], index: 1, kind: input, shape index: {}]   ;;  %s1487_s2 = inlined_call_operand.vmem [shape: f32[1,128], index: 2, kind: input, shape index: {}]   ;;  %s1488_s3 = inlined_call_operand.vmem [shape: f32[1,128], index: 3, kind: input, shape index: {}]   ;;  %s1489_s4 = inlined_call_operand.vmem [shape: f32[1,128], index: 4, kind: input, shape index: {}]   ;;  %s1490_s5 = inlined_call_operand.hbm [shape: f32[128,128], index: 5, kind: input, shape index: {}]   ;;  %s1491_s6 = inlined_call_operand.vmem [shape: f32[1,128], index: 6, kind: input, shape index: {}]   ;;  %s1492_s7 = inlined_call_operand.hbm [shape: f32[8,128], index: 7, kind: output, shape index: {}]  }
   0x1   :  { %13 = vsyncpa [#allocation6], 0 }
   0x2   :  { %14 = vsyncpa [#allocation4], 0  ;;  %s1371_s24 = smov [#allocation5]   ;;  %s1277_s28 = scalar_lea.hbm %s1486_s1, 8192 }
   0x3   :  { %s30_s25 = sshll.u32 %s1371_s24, 4  ;;  %p1278_p0 = scmp.ne.s32.totalorder %s1486_s1, %s1277_s28  ;;  %s31_s25 = int_to_ptr.vmem [resolvable:$true] %s30_s25 }
   0x4   :  { %p1281_p1 = scmp.lt.u32.totalorder %s1277_s28, %s1486_s1 }
   0x6   :  { %p1283_p2 = pnand %p1281_p1, %p1278_p0 }
   0x8   :  { %1286 = shalt.err (!%p1283_p2)
}
   0x9   :  { %s1287_s10 = scalar_lea.vmem %s31_s25, 8192  ;;  %p1292_p4 = scmp.lt.s32.totalorder %s31_s25, %s31_s25 }
   0xa   :  { %p1288_p3 = scmp.ne.s32.totalorder %s31_s25, %s1287_s10  ;;  %p1293_p5 = scmp.lt.s32.totalorder %s1287_s10, %s1287_s10 }
   0xc   :  { %p1294_p6 = por %p1293_p5, %p1292_p4 }
   0xe   :  { %p1295_p7 = pnand %p1294_p6, %p1288_p3 }
  0x10   :  { %1298 = shalt.err (!%p1295_p7)
}
  0x11   :  { %s1372_s11 = smov 64   ;;  %s1373_s12 = smov 4  }
  0x12   :  { %36 = dma.hbm_to_vmem [thread:$0]  %s1486_s1, 8192, %s31_s25, [#allocation6], %s1372_s11, %s1372_s11, %s1373_s12  }
  0x13   :  { %s1374_s15 = smov [#allocation2]   ;;  %s1375_s17 = smov [#allocation7]  }
  0x14   :  { %s21_s16 = sshll.u32 %s1374_s15, 4  ;;  %s48_s18 = sshll.u32 %s1375_s17, 4  ;;  %s22_s16 = int_to_ptr.vmem [resolvable:$true] %s21_s16  ;;  %s49_s18 = int_to_ptr.vmem [resolvable:$true] %s48_s18 }
  0x15   :  { %s1299_s21 = scalar_lea.hbm %s1485_s0, 512 }
  0x16   :  { %p1300_p8 = scmp.ne.s32.totalorder %s1485_s0, %s1299_s21  ;;  %p1303_p9 = scmp.lt.u32.totalorder %s1299_s21, %s1485_s0 }
  0x18   :  { %p1305_p10 = pnand %p1303_p9, %p1300_p8 }
  0x1a   :  { %1308 = shalt.err (!%p1305_p10)
}
  0x1b   :  { %s1309_s1 = scalar_lea.vmem %s22_s16, 512  ;;  %p1314_p12 = scmp.lt.s32.totalorder %s22_s16, %s22_s16 }
  0x1c   :  { %p1310_p11 = scmp.ne.s32.totalorder %s22_s16, %s1309_s1  ;;  %p1315_p13 = scmp.lt.s32.totalorder %s1309_s1, %s1309_s1 }
  0x1e   :  { %p1316_p0 = por %p1315_p13, %p1314_p12 }
  0x20   :  { %p1317_p1 = pnand %p1316_p0, %p1310_p11 }
  0x22   :  { %1320 = shalt.err (!%p1317_p1)
}
  0x23   :  { %24 = dma.hbm_to_vmem [thread:$0]  %s1485_s0, 512, %s22_s16, [#allocation3]  }
  0x24   :  { %s1321_s30 = scalar_lea.hbm %s1490_s5, 2048 }
  0x25   :  { %p1322_p2 = scmp.ne.s32.totalorder %s1490_s5, %s1321_s30  ;;  %p1325_p3 = scmp.lt.u32.totalorder %s1321_s30, %s1490_s5 }
  0x27   :  { %p1327_p4 = pnand %p1325_p3, %p1322_p2 }
  0x29   :  { %1330 = shalt.err (!%p1327_p4)
}
  0x2a   :  { %s1331_s12 = scalar_lea.vmem %s49_s18, 2048  ;;  %p1336_p6 = scmp.lt.s32.totalorder %s49_s18, %s49_s18 }
  0x2b   :  { %p1332_p5 = scmp.ne.s32.totalorder %s49_s18, %s1331_s12  ;;  %p1337_p7 = scmp.lt.s32.totalorder %s1331_s12, %s1331_s12 }
  0x2d   :  { %p1338_p8 = por %p1337_p7, %p1336_p6 }
  0x2f   :  { %p1339_p9 = pnand %p1338_p8, %p1332_p5 }
  0x31   :  { %1342 = shalt.err (!%p1339_p9)
}
  0x32   :  { %s1376_s0 = smov 128   ;;  %s1377_s13 = smov 8  }
  0x33   :  { %54 = dma.hbm_to_vmem [thread:$0]  %s1490_s5, 2048, %s49_s18, [#allocation6], %s1376_s0, %s1376_s0, %s1377_s13  }
  0x34   :  { %1365 = dma.done.wait [#allocation3], 512  }
  0x35   :  { %1366 = vsyncadd [#allocation3], 4294966784 }
  0x36   :  { %1367 = dma.done.wait [#allocation6], 10240  }
  0x37   :  { %1368 = vsyncadd [#allocation6], 4294957056  ;;  %v1197_v0 = vld [vmem:[#allocation5 + $0x40] sm:$0xff]   ;;  %v1201_v4 = vld [vmem:[#allocation5 + $0x48] sm:$0xff]   ;;  %vm1379_vm0 = vmmov 0  }
  0x38   :  { %v1198_v1 = vld [vmem:[#allocation5 + $0xc0] sm:$0xff]   ;;  %1022 = vmatprep.subr.bf16.mxu0 %v1197_v0  ;;  %v1202_v5 = vld [vmem:[#allocation5 + $0xc8] sm:$0xff]   ;;  %v1205_v8 = vld [vmem:[#allocation5 + $0x50] sm:$0xff]  }
  0x39   :  { %v1199_v2 = vld [vmem:[#allocation5] sm:$0xff]   ;;  %1044 = vmatprep.subr.bf16.mxu1 %v1198_v1  ;;  %v1203_v6 = vld [vmem:[#allocation5 + $0x8] sm:$0xff]   ;;  %v1206_v9 = vld [vmem:[#allocation5 + $0xd0] sm:$0xff]  }
  0x3a   :  { %v1200_v3 = vld [vmem:[#allocation5 + $0x80] sm:$0xff]   ;;  %1023 = vmatpush3.bf16.msra.mxu0 %v1199_v2  ;;  %v1204_v7 = vld [vmem:[#allocation5 + $0x88] sm:$0xff]   ;;  %v1207_v10 = vld [vmem:[#allocation5 + $0x10] sm:$0xff]  }
  0x3b   :  { %1045 = vmatpush3.bf16.msra.mxu1 %v1200_v3  ;;  %1024 = vmatprep.subr.bf16.mxu0 %v1201_v4  ;;  %v1208_v11 = vld [vmem:[#allocation5 + $0x90] sm:$0xff]   ;;  %v1209_v12 = vld [vmem:[#allocation5 + $0x58] sm:$0xff]   ;;  %v1213_v16 = vld [vmem:[#allocation5 + $0x60] sm:$0xff]  }
  0x3c   :  { %1046 = vmatprep.subr.bf16.mxu1 %v1202_v5  ;;  %v1210_v13 = vld [vmem:[#allocation5 + $0xd8] sm:$0xff]   ;;  %v1214_v17 = vld [vmem:[#allocation5 + $0xe0] sm:$0xff]   ;;  %v1217_v20 = vld [vmem:[#allocation5 + $0x68] sm:$0xff]  }
  0x3d   :  { %v1211_v14 = vld [vmem:[#allocation5 + $0x18] sm:$0xff]   ;;  %v1215_v18 = vld [vmem:[#allocation5 + $0x20] sm:$0xff]   ;;  %v1218_v21 = vld [vmem:[#allocation5 + $0xe8] sm:$0xff]  }
  0x3e   :  { %1025 = vmatpush3.bf16.msra.mxu0 %v1203_v6  ;;  %v1212_v15 = vld [vmem:[#allocation5 + $0x98] sm:$0xff]   ;;  %v1216_v19 = vld [vmem:[#allocation5 + $0xa0] sm:$0xff]   ;;  %v1219_v22 = vld [vmem:[#allocation5 + $0x28] sm:$0xff]  }
  0x3f   :  { %1047 = vmatpush3.bf16.msra.mxu1 %v1204_v7  ;;  %1026 = vmatprep.subr.bf16.mxu0 %v1205_v8  ;;  %v1220_v23 = vld [vmem:[#allocation5 + $0xa8] sm:$0xff]   ;;  %v1221_v24 = vld [vmem:[#allocation5 + $0x70] sm:$0xff]   ;;  %v1225_v28 = vld [vmem:[#allocation5 + $0x78] sm:$0xff]  }
  0x40   :  { %1048 = vmatprep.subr.bf16.mxu1 %v1206_v9  ;;  %v1222_v25 = vld [vmem:[#allocation5 + $0xf0] sm:$0xff]   ;;  %v1226_v29 = vld [vmem:[#allocation5 + $0xf8] sm:$0xff]   ;;  %v67_v32 = vld [vmem:[#allocation2] sm:$0xff] }
  0x41   :  { %v1223_v26 = vld [vmem:[#allocation5 + $0x30] sm:$0xff]   ;;  %v1227_v30 = vld [vmem:[#allocation5 + $0x38] sm:$0xff]   ;;  %v68_v33 = vld [vmem:[#allocation2 + $0x8] sm:$0xff]  ;;  %v949_v34 = vcombine.low %v67_v32, %v67_v32  ;;  %v950_v35 = vcombine.high %v67_v32, %v67_v32 }
  0x42   :  { %1027 = vmatpush3.bf16.msra.mxu0 %v1207_v10  ;;  %v1224_v27 = vld [vmem:[#allocation5 + $0xb0] sm:$0xff]   ;;  %v1228_v31 = vld [vmem:[#allocation5 + $0xb8] sm:$0xff]   ;;  %v951_v36 = vcombine.low %v68_v33, %v68_v33  ;;  %v952_v37 = vcombine.high %v68_v33, %v68_v33  ;;  %v1233_v38 = vld [vmem:[#allocation5 + $0x140] sm:$0xff]  }
  0x43   :  { %1049 = vmatpush3.bf16.msra.mxu1 %v1208_v11  ;;  %1028 = vmatprep.subr.bf16.mxu0 %v1209_v12  ;;  %v1234_v39 = vld [vmem:[#allocation5 + $0x1c0] sm:$0xff]   ;;  %v1237_v42 = vld [vmem:[#allocation5 + $0x148] sm:$0xff]   ;;  %v1241_v46 = vld [vmem:[#allocation5 + $0x150] sm:$0xff]  }
  0x44   :  { %1050 = vmatprep.subr.bf16.mxu1 %v1210_v13  ;;  %650 = vmatprep.mubr.bf16.mxu0 %v950_v35  ;;  %v1235_v40 = vld [vmem:[#allocation5 + $0x100] sm:$0xff]   ;;  %v1238_v43 = vld [vmem:[#allocation5 + $0x1c8] sm:$0xff]   ;;  %v1242_v47 = vld [vmem:[#allocation5 + $0x1d0] sm:$0xff]  }
  0x45   :  { %690 = vmatprep.mubr.bf16.mxu1 %v952_v37  ;;  %v1236_v41 = vld [vmem:[#allocation5 + $0x180] sm:$0xff]   ;;  %v1239_v44 = vld [vmem:[#allocation5 + $0x108] sm:$0xff]   ;;  %v1243_v48 = vld [vmem:[#allocation5 + $0x110] sm:$0xff]  }
  0x46   :  { %1029 = vmatpush3.bf16.msra.mxu0 %v1211_v14  ;;  %v1240_v45 = vld [vmem:[#allocation5 + $0x188] sm:$0xff]   ;;  %v1244_v49 = vld [vmem:[#allocation5 + $0x190] sm:$0xff]   ;;  %v1245_v50 = vld [vmem:[#allocation5 + $0x158] sm:$0xff]  }
  0x47   :  { %1051 = vmatpush3.bf16.msra.mxu1 %v1212_v15  ;;  %1030 = vmatprep.subr.bf16.mxu0 %v1213_v16  ;;  %v1246_v51 = vld [vmem:[#allocation5 + $0x1d8] sm:$0xff]   ;;  %v1249_v54 = vld [vmem:[#allocation5 + $0x160] sm:$0xff]   ;;  %v1253_v58 = vld [vmem:[#allocation5 + $0x168] sm:$0xff]   ;;  %v1378_v15 = vmov 0.0|0.0  }
  0x48   :  { %1052 = vmatprep.subr.bf16.mxu1 %v1214_v17  ;;  %v1247_v52 = vld [vmem:[#allocation5 + $0x118] sm:$0xff]   ;;  %v1250_v55 = vld [vmem:[#allocation5 + $0x1e0] sm:$0xff]   ;;  %v1254_v59 = vld [vmem:[#allocation5 + $0x1e8] sm:$0xff]  }
  0x49   :  { %v1248_v53 = vld [vmem:[#allocation5 + $0x198] sm:$0xff]   ;;  %v1251_v56 = vld [vmem:[#allocation5 + $0x120] sm:$0xff]   ;;  %v1255_v60 = vld [vmem:[#allocation5 + $0x128] sm:$0xff]  }
  0x4a   :  { %1031 = vmatpush3.bf16.msra.mxu0 %v1215_v18  ;;  %v1252_v57 = vld [vmem:[#allocation5 + $0x1a0] sm:$0xff]   ;;  %v1256_v61 = vld [vmem:[#allocation5 + $0x1a8] sm:$0xff]   ;;  %v1257_v62 = vld [vmem:[#allocation5 + $0x170] sm:$0xff]  }
  0x4b   :  { %1053 = vmatpush3.bf16.msra.mxu1 %v1216_v19  ;;  %1032 = vmatprep.subr.bf16.mxu0 %v1217_v20  ;;  %v1258_v63 = vld [vmem:[#allocation5 + $0x1f0] sm:$0xff]   ;;  %v1261_v2 = vld [vmem:[#allocation5 + $0x178] sm:$0xff]   ;;  %v819_v12 = vld [vmem:[#allocation7] sm:$0xff] }
  0x4c   :  { %1054 = vmatprep.subr.bf16.mxu1 %v1218_v21  ;;  %v1259_v0 = vld [vmem:[#allocation5 + $0x130] sm:$0xff]   ;;  %v1262_v3 = vld [vmem:[#allocation5 + $0x1f8] sm:$0xff]   ;;  %v820_v13 = vld [vmem:[#allocation7 + $0x8] sm:$0xff] }
  0x4d   :  { %v1260_v1 = vld [vmem:[#allocation5 + $0x1b0] sm:$0xff]   ;;  %v1263_v4 = vld [vmem:[#allocation5 + $0x138] sm:$0xff]   ;;  %v1163_v14 = vpack.c.bf16 %v820_v13, %v819_v12  ;;  %v823_v19 = vld [vmem:[#allocation7 + $0x20] sm:$0xff] }
  0x4e   :  { %1033 = vmatpush3.bf16.msra.mxu0 %v1219_v22  ;;  %v1264_v5 = vld [vmem:[#allocation5 + $0x1b8] sm:$0xff]   ;;  %v69_v6 = vld [vmem:[#allocation2 + $0x10] sm:$0xff]  ;;  %v824_v20 = vld [vmem:[#allocation7 + $0x28] sm:$0xff] }
  0x4f   :  { %1055 = vmatpush3.bf16.msra.mxu1 %v1220_v23  ;;  %1034 = vmatprep.subr.bf16.mxu0 %v1221_v24  ;;  %v953_v7 = vcombine.low %v69_v6, %v69_v6  ;;  %v954_v8 = vcombine.high %v69_v6, %v69_v6  ;;  %v70_v9 = vld [vmem:[#allocation2 + $0x18] sm:$0xff]  ;;  %v821_v16 = vld [vmem:[#allocation7 + $0x10] sm:$0xff]  ;;  %v1169_v21 = vpack.c.bf16 %v824_v20, %v823_v19  ;;  %v831_v32 = vld [vmem:[#allocation7 + $0x60] sm:$0xff] }
  0x50   :  { %1056 = vmatprep.subr.bf16.mxu1 %v1222_v25  ;;  %v955_v10 = vcombine.low %v70_v9, %v70_v9  ;;  %v956_v11 = vcombine.high %v70_v9, %v70_v9  ;;  %v822_v17 = vld [vmem:[#allocation7 + $0x18] sm:$0xff]  ;;  %v825_v22 = vld [vmem:[#allocation7 + $0x30] sm:$0xff]  ;;  %v1380_v25 = vmov 0.0   ;;  %v832_v33 = vld [vmem:[#allocation7 + $0x68] sm:$0xff] }
  0x51   :  { %v1166_v18 = vpack.c.bf16 %v822_v17, %v821_v16  ;;  %v826_v23 = vld [vmem:[#allocation7 + $0x38] sm:$0xff]  ;;  %v833_v35 = vld [vmem:[#allocation7 + $0x70] sm:$0xff]  ;;  %v803_v16 = vlaneseq }
  0x52   :  { %1035 = vmatpush3.bf16.msra.mxu0 %v1223_v26  ;;  %v1172_v24 = vpack.c.bf16 %v826_v23, %v825_v22  ;;  %v827_v26 = vld [vmem:[#allocation7 + $0x40] sm:$0xff] }
  0x53   :  { %1057 = vmatpush3.bf16.msra.mxu1 %v1224_v27  ;;  %1036 = vmatprep.subr.bf16.mxu0 %v1225_v28  ;;  %v828_v27 = vld [vmem:[#allocation7 + $0x48] sm:$0xff]  ;;  %v804_v17 = vshrl.u32 %v803_v16, 7  ;;  %v799_v22 = vld [vmem:[%s1489_s4] sm:$0x1]  ;;  %s1381_s4 = smov [#allocation8]  }
  0x54   :  { %1058 = vmatprep.subr.bf16.mxu1 %v1226_v29  ;;  %v1175_v28 = vpack.c.bf16 %v828_v27, %v827_v26  ;;  %v829_v29 = vld [vmem:[#allocation7 + $0x50] sm:$0xff] }
  0x55   :  { %v805_v19 = vsub.s32 0, %v804_v17 }
  0x56   :  { %1037 = vmatpush3.bf16.msra.mxu0 %v1227_v30  ;;  %v830_v30 = vld [vmem:[#allocation7 + $0x58] sm:$0xff] }
  0x57   :  { %1059 = vmatpush3.bf16.msra.mxu1 %v1228_v31  ;;  %1066 = vmatprep.subr.bf16.mxu0 %v1233_v38  ;;  %v1178_v31 = vpack.c.bf16 %v830_v30, %v829_v29 }
  0x58   :  { %1088 = vmatprep.subr.bf16.mxu1 %v1234_v39 }
  0x59   :  { %651 = vmatmul.mubr.bf16.vlgmr.msra.gmra.mrb[0].mxu0 %v949_v34  ;;  %v1181_v34 = vpack.c.bf16 %v832_v33, %v831_v32  ;;  %v1021_v32 = vld [vmem:[%s1491_s6] ss:$0 sm:$0xff]  ;;  %s938_s6 = sshll.u32 %s1381_s4, 4  ;;  %s939_s6 = int_to_ptr.vmem [resolvable:$true] %s938_s6 }
  0x5a   :  { %691 = vmatmul.mubr.bf16.vlgmr.msra.gmra.mrb[0].mxu1 %v951_v36  ;;  %1067 = vmatpush3.bf16.msra.mxu0 %v1235_v40  ;;  %v834_v36 = vld [vmem:[#allocation7 + $0x78] sm:$0xff]  ;;  %v948_v40 = vld [vmem:[%s1487_s2] ss:$0 sm:$0xff]  ;;  %s1343_s21 = scalar_lea.vmem %s939_s6, 128  ;;  %p1348_p11 = scmp.lt.s32.totalorder %s939_s6, %s939_s6 }
  0x5b   :  { %1089 = vmatpush3.bf16.msra.mxu1 %v1236_v41  ;;  %1068 = vmatprep.subr.bf16.mxu0 %v1237_v42  ;;  %v1184_v37 = vpack.c.bf16 %v834_v36, %v833_v35  ;;  %p1344_p10 = scmp.ne.s32.totalorder %s939_s6, %s1343_s21  ;;  %p1349_p12 = scmp.lt.s32.totalorder %s1343_s21, %s1343_s21 }
  0x5c   :  { %1090 = vmatprep.subr.bf16.mxu1 %v1238_v43  ;;  %730 = vmatprep.mubr.bf16.mxu0 %v954_v8 }
  0x5d   :  { %770 = vmatprep.mubr.bf16.mxu1 %v956_v11  ;;  %p1350_p13 = por %p1349_p12, %p1348_p11 }
  0x5e   :  { %1069 = vmatpush3.bf16.msra.mxu0 %v1239_v44 }
  0x5f   :  { %1091 = vmatpush3.bf16.msra.mxu1 %v1240_v45  ;;  %1070 = vmatprep.subr.bf16.mxu0 %v1241_v46  ;;  %p1351_p0 = pnand %p1350_p13, %p1344_p10 }
  0x60   :  { %1092 = vmatprep.subr.bf16.mxu1 %v1242_v47 }
  0x62   :  { %1071 = vmatpush3.bf16.msra.mxu0 %v1243_v48 }
  0x63   :  { %1093 = vmatpush3.bf16.msra.mxu1 %v1244_v49  ;;  %1072 = vmatprep.subr.bf16.mxu0 %v1245_v50 }
  0x64   :  { %1094 = vmatprep.subr.bf16.mxu1 %v1246_v51 }
  0x66   :  { %1073 = vmatpush3.bf16.msra.mxu0 %v1247_v52 }
  0x67   :  { %1095 = vmatpush3.bf16.msra.mxu1 %v1248_v53  ;;  %1074 = vmatprep.subr.bf16.mxu0 %v1249_v54 }
  0x68   :  { %1096 = vmatprep.subr.bf16.mxu1 %v1250_v55 }
  0x6a   :  { %1075 = vmatpush3.bf16.msra.mxu0 %v1251_v56 }
  0x6b   :  { %1097 = vmatpush3.bf16.msra.mxu1 %v1252_v57  ;;  %1076 = vmatprep.subr.bf16.mxu0 %v1253_v58 }
  0x6c   :  { %1098 = vmatprep.subr.bf16.mxu1 %v1254_v59 }
  0x6e   :  { %1077 = vmatpush3.bf16.msra.mxu0 %v1255_v60 }
  0x6f   :  { %1099 = vmatpush3.bf16.msra.mxu1 %v1256_v61  ;;  %1078 = vmatprep.subr.bf16.mxu0 %v1257_v62 }
  0x70   :  { %1100 = vmatprep.subr.bf16.mxu1 %v1258_v63 }
  0x72   :  { %1079 = vmatpush3.bf16.msra.mxu0 %v1259_v0 }
  0x73   :  { %1101 = vmatpush3.bf16.msra.mxu1 %v1260_v1  ;;  %1080 = vmatprep.subr.bf16.mxu0 %v1261_v2 }
  0x74   :  { %1102 = vmatprep.subr.bf16.mxu1 %v1262_v3 }
  0x76   :  { %1081 = vmatpush3.bf16.msra.mxu0 %v1263_v4 }
  0x77   :  { %1103 = vmatpush3.bf16.msra.mxu1 %v1264_v5  ;;  %1162 = vmatprep.subr.bf16.mxu0 %v1378_v15 }
  0x79   :  { %731 = vmatmul.mubr.bf16.vlgmr.msra.gmra.mrb[4].mxu0 %v953_v7 }
  0x7a   :  { %771 = vmatmul.mubr.bf16.vlgmr.msra.gmra.mrb[4].mxu1 %v955_v10  ;;  %1164 = vmatpush3.bf16.msra.mxu0 %v1163_v14 }
  0x7b   :  { %1165 = vmatprep.subr.bf16.mxu0 %v1378_v15  ;;  %1159 = vmatprep.mubr.msk.f32.mxu0 %vm1379_vm0, %v1380_v25 }
  0x7e   :  { %1167 = vmatpush3.bf16.msra.mxu0 %v1166_v18  ;;  %v795_v18 = vld [vmem:[%s1488_s3] sm:$0x1] }
  0x7f   :  { %1168 = vmatprep.subr.bf16.mxu0 %v1378_v15 }
  0x82   :  { %1170 = vmatpush3.bf16.msra.mxu0 %v1169_v21 }
  0x83   :  { %1171 = vmatprep.subr.bf16.mxu0 %v1378_v15 }
  0x86   :  { %1173 = vmatpush3.bf16.msra.mxu0 %v1172_v24 }
  0x87   :  { %1174 = vmatprep.subr.bf16.mxu0 %v1378_v15 }
  0x8a   :  { %1176 = vmatpush3.bf16.msra.mxu0 %v1175_v28 }
  0x8b   :  { %1177 = vmatprep.subr.bf16.mxu0 %v1378_v15 }
  0x8e   :  { %1179 = vmatpush3.bf16.msra.mxu0 %v1178_v31  ;;  %v913_v31 = vand.u32 127, %v803_v16 }
  0x8f   :  { %1180 = vmatprep.subr.bf16.mxu0 %v1378_v15 }
  0x90   :  { %vm914_vm2 = vcmp.lt.s32.totalorder %v913_v31, 10  ;;  %vm926_vm3 = vcmp.lt.s32.totalorder %v913_v31, 12 }
  0x92   :  { %1182 = vmatpush3.bf16.msra.mxu0 %v1181_v34 }
  0x93   :  { %1183 = vmatprep.subr.bf16.mxu0 %v1378_v15 }
  0x96   :  { %1185 = vmatpush3.bf16.msra.mxu0 %v1184_v37 }
 0x12c   :  { %v1038_v38 = vpop.f32.mrb[0].mxu0 }
 0x12d   :  { %v1060_v39 = vpop.f32.mrb[0].mxu1  ;;  %v1039_v41 = vpop.f32.mrb[1].mxu0 }
 0x12e   :  { %v1061_v42 = vpop.f32.mrb[1].mxu1  ;;  %v1040_v43 = vadd.f32 %v1039_v41, %v1038_v38  ;;  %v1041_v45 = vpop.f32.mrb[2].mxu0 }
 0x12f   :  { %v1062_v44 = vadd.f32 %v1061_v42, %v1060_v39  ;;  %v1063_v46 = vpop.f32.mrb[2].mxu1  ;;  %v1042_v47 = vpop.f32.mrb[3].mxu0 }
 0x130   :  { %v1064_v48 = vpop.f32.mrb[3].mxu1  ;;  %v653_v49 = vadd.f32 %v1040_v43, %v948_v40 }
 0x132   :  { %v693_v50 = vadd.f32 %v1062_v44, %v653_v49 }
 0x14c   :  { %v1082_v51 = vpop.f32.mrb[4].mxu0 }
 0x14d   :  { %v1104_v52 = vpop.f32.mrb[4].mxu1  ;;  %v1083_v53 = vpop.f32.mrb[5].mxu0 }
 0x14e   :  { %v1105_v54 = vpop.f32.mrb[5].mxu1  ;;  %v1084_v55 = vadd.f32 %v1083_v53, %v1082_v51  ;;  %v1085_v57 = vpop.f32.mrb[6].mxu0 }
 0x14f   :  { %v1106_v56 = vadd.f32 %v1105_v54, %v1104_v52  ;;  %v1107_v58 = vpop.f32.mrb[6].mxu1  ;;  %v1086_v59 = vpop.f32.mrb[7].mxu0 }
 0x150   :  { %v1108_v60 = vpop.f32.mrb[7].mxu1  ;;  %v733_v61 = vadd.f32 %v1084_v55, %v693_v50 }
 0x152   :  { %v773_v62 = vadd.f32 %v1106_v56, %v733_v61 }
 0x154   :  { %v778_v63 = vrot.slane %v773_v62, 4 }
 0x156   :  { %v779_v0 = vadd.f32 %v778_v63, %v773_v62 }
 0x158   :  { %v780_v1 = vrot.slane %v779_v0, 2 }
 0x15a   :  { %v781_v2 = vadd.f32 %v780_v1, %v779_v0 }
 0x15c   :  { %v782_v3 = vrot.slane %v781_v2, 1 }
 0x15e   :  { %v783_v4 = vadd.f32 %v782_v3, %v781_v2 }
 0x160   :  { %v785_v5 = vmul.f32 0.125, %v783_v4 }
 0x162   :  { %v786_v6 = vsub.f32 %v773_v62, %v785_v5 }
 0x164   :  { %v787_v7 = vmul.f32 %v786_v6, %v786_v6 }
 0x166   :  { %v788_v8 = vrot.slane %v787_v7, 4 }
 0x168   :  { %v789_v9 = vadd.f32 %v788_v8, %v787_v7 }
 0x16a   :  { %v790_v10 = vrot.slane %v789_v9, 2 }
 0x16c   :  { %v791_v11 = vadd.f32 %v790_v10, %v789_v9 }
 0x16e   :  { %v792_v12 = vrot.slane %v791_v11, 1 }
 0x170   :  { %v793_v13 = vadd.f32 %v792_v12, %v791_v11 }
 0x172   :  { %v794_v14 = vmul.f32 0.125, %v793_v13 }
 0x174   :  { %v796_v15 = vadd.f32 1e-05, %v794_v14 }
 0x176   :  { %1269 = vrsqrt.f32 %v796_v15 }
 0x180   :  { %v1270_v20 = vpop.eup %1269 }
 0x181   :  { %v798_v21 = vmul.f32 %v1270_v20, %v795_v18 }
 0x183   :  { %v800_v23 = vmul.f32 %v798_v21, %v785_v5  ;;  %v806_v24 = vrot.slane %v798_v21, %v805_v19 }
 0x185   :  { %v801_v25 = vsub.f32 %v799_v22, %v800_v23  ;;  %v808_v26 = vmul.f32 %v806_v24, %v773_v62 }
 0x187   :  { %v813_v27 = vrot.slane %v801_v25, %v805_v19 }
 0x189   :  { %v815_v28 = vadd.f32 %v813_v27, %v808_v26 }
 0x18b   :  { %vm816_vm1 = vcmp.gt.f32.partialorder %v815_v28, 0.0  ;;  %v817_v29 = vmul.f32 0.2, %v815_v28 }
 0x18d   :  { %v818_v30 = vsel %vm816_vm1, %v815_v28, %v817_v29 }
 0x18e   :  { %1160 = vmatmul.mubr.f32.vlgmr.msra.gmra.mrb[8].mxu0 %v818_v30 }
 0x261   :  { %v908_v33 = vpop.f32.mrb[8].mxu0 }
 0x262   :  { %v909_v34 = vadd.f32 %v1021_v32, %v908_v33  ;;  %v1161_v35 = vpop.f32.mrb[9].mxu0 }
 0x264   :  { %v927_v36 = vmul.f32 1.442695, %v909_v34  ;;  %v915_v37 = vsel %vm914_vm2, %v909_v34, -3e+38 }
 0x265   :  { %916 = vmax.xlane.f32.xlu0 %v915_v37 }
 0x266   :  { %1271 = vpow2.f32 %v927_v36 }
 0x270   :  { %v1272_v38 = vpop.eup %1271 }
 0x271   :  { %v929_v39 = vsel %vm926_vm3, %v909_v34, %v1272_v38 }
 0x2f2   :  { %v917_v40 = vpop.xlane.xlu0 %916 }
 0x2f3   :  { %v918_v41 = vsub.f32 %v915_v37, %v917_v40 }
 0x2f5   :  { %v919_v42 = vmul.f32 1.442695, %v918_v41 }
 0x2f7   :  { %1273 = vpow2.f32 %v919_v42 }
 0x301   :  { %v1274_v43 = vpop.eup %1273 }
 0x302   :  { %v921_v44 = vsel %vm914_vm2, %v1274_v43, 0.0 }
 0x303   :  { %922 = vadd.xlane.f32.xlu0 %v921_v44 }
 0x390   :  { %v923_v45 = vpop.xlane.xlu0 %922 }
 0x391   :  { %1275 = vrcp.f32 %v923_v45 }
 0x39b   :  { %v1276_v46 = vpop.eup %1275 }
 0x39c   :  { %v925_v47 = vmul.f32 %v1276_v46, %v921_v44 }
 0x39e   :  { %v930_v48 = vsel %vm914_vm2, %v925_v47, %v929_v39 }
 0x39f   :  { %931 = vst [vmem:[#allocation8] sm:$0xff] %v930_v48 }
 0x3a0   :  { %1354 = shalt.err (!%p1351_p0)
}
 0x3a1   :  { %s1355_s24 = scalar_lea.hbm %s1492_s7, 128 }
 0x3a2   :  { %p1356_p1 = scmp.ne.s32.totalorder %s1492_s7, %s1355_s24  ;;  %p1359_p2 = scmp.lt.u32.totalorder %s1355_s24, %s1492_s7 }
 0x3a4   :  { %p1361_p3 = pnand %p1359_p2, %p1356_p1 }
 0x3a6   :  { %1364 = shalt.err (!%p1361_p3)
}
 0x3a7   :  { %941 = dma.vmem_to_hbm [thread:$0]  %s939_s6, 128, %s1492_s7, [#allocation4]  }
 0x3a8   :  { %1369 = dma.done.wait [#allocation4], 128  }
 0x3a9   :  { %1370 = vsyncadd [#allocation4], 4294967168 }
 0x3aa   :  { %945 = vsyncpa [#allocation3], 1 }
 0x3ab   :  { %946 = vsyncpa [#allocation6], 1 }
 0x3ac   :  { %947 = vsyncpa [#allocation4], 1 }

</bundles_post_ra>
